<compile_context>
chip_gen: v7x
topology: tpu7x:2x2x1
jax: 0.10.0
libtpu: 0.0.40
codegen_flags: <defaults>
</compile_context>

<pallas_src>
import jax
import jax.numpy as jnp
from jax.experimental import pallas as pl
from jax.experimental.pallas import tpu as pltpu


def _residual_linear_kernel(x_ref, wt_ref, b_ref, o_ref):
    """Resident-weight path. wt_ref is the full (H_in, H_out) transposed weight."""
    x = x_ref[...]                                    # (tm, H) original precision
    y = jax.lax.dot_general(
        x.astype(wt_ref.dtype), wt_ref[...],          # bf16 MXU operands by default
        dimension_numbers=(((1,), (0,)), ((), ())),   # standard (M,K)x(K,N)
        preferred_element_type=jnp.float32)           # f32 accumulation
    y = y + b_ref[...]                                # bias add in f32
    y = y + x.astype(jnp.float32)                     # residual at ORIGINAL precision
    o_ref[...] = y.astype(o_ref.dtype)                # single cast on store


def _residual_linear_ntiled_kernel(x_ref, xres_ref, wt_ref, b_ref, o_ref):
    """N-tiled path. wt block is (H_in, tn); residual comes from a (tm, tn) x slice."""
    y = jax.lax.dot_general(
        x_ref[...].astype(wt_ref.dtype), wt_ref[...],
        dimension_numbers=(((1,), (0,)), ((), ())),
        preferred_element_type=jnp.float32)
    y = y + b_ref[...]
    y = y + xres_ref[...].astype(jnp.float32)         # full-precision residual slice
    o_ref[...] = y.astype(o_ref.dtype)


def _vmem_capacity_bytes():
    try:
        return int(pltpu.get_tpu_info().vmem_capacity_bytes)
    except Exception:
        return 64 * 1024 * 1024        # conservative fallback: v7x per-TC VMEM


def residual_add_linear(x, w, b, *, tm=None, tn=None, use_bf16_matmul=True):
    """out = x @ w.T + b + x (ResidualAdd(nn.Linear(H, H))), x: [B, S, H]."""
    B, S, H = x.shape
    M = B * S
    out_dtype = x.dtype

    x2 = x.reshape(M, H)
    b2 = b.reshape(1, H).astype(jnp.float32)

    # MXU operand dtype. The residual always uses the original-precision x
    # (the cast to mxu_dtype happens inside the kernel, matmul operand only).
    mxu_dtype = jnp.bfloat16 if (use_bf16_matmul and x.dtype == jnp.float32) else x.dtype
    # One-time transpose (+cast) of W -> standard contraction on the MXU; the
    # single H x H pass is negligible next to the M*H*H matmul.
    wt = jnp.transpose(w).astype(mxu_dtype)           # (H_in, H_out)

    x_item = jnp.dtype(x2.dtype).itemsize
    w_item = jnp.dtype(mxu_dtype).itemsize
    out_item = jnp.dtype(out_dtype).itemsize

    cap = _vmem_capacity_bytes()                      # 128 MiB v5e/v6e, 64 MiB/TC v7x
    budget = min(int(cap * 0.85), 100 * 1024 * 1024)  # usable planning budget

    # ---- N-tiling over out_features: only when the resident weight would eat
    # more than ~half the budget (keeps VMEM from scaling as H^2). ----
    if tn is None:
        if H % 128 == 0 and H * H * w_item > budget // 2:
            tn = max(128, ((budget // 2) // (H * w_item)) // 128 * 128)
            tn = min(tn, H)
        else:
            tn = H
    tn = min(int(tn), H)
    n_tiled = tn < H
    if n_tiled and (H % 128 != 0 or tn % 128 != 0):
        # TODO(synk): pad H to a lane multiple instead of falling back to resident W.
        tn, n_tiled = H, False
    grid_n = pl.cdiv(H, tn)

    # ---- M tile from the remaining VMEM budget. ----
    x_bufs = 3 if (not n_tiled and H <= 1024) else 2  # deeper pipeline for small-H (v5e)
    w_bytes = H * tn * w_item                         # single-buffered (Buffered(1))
    b_bytes = tn * 4
    per_row = (x_bufs * H * x_item                    # pipelined x tiles
               + 2 * tn * out_item                    # double-buffered out tile
               + tn * 4                               # f32 matmul result
               + H * w_item)                          # in-kernel cast copy of x operand
    if n_tiled:
        per_row += 2 * tn * x_item                    # double-buffered residual tile
    tm_cap = 1024 if H <= 2048 else 512
    if tm is None:
        tm = max(8, (budget - w_bytes - b_bytes) // max(per_row, 1))
    tm = min(int(tm), tm_cap)
    if tm >= M:
        tm = M
    else:
        tm = max(8, (tm // 8) * 8)
    grid_m = pl.cdiv(M, tm)
    if x_bufs == 3 and grid_m < 3:
        x_bufs = 2                                    # no point buffering past the grid

    # ---- Always set a VMEM limit; clamp to the per-generation ceiling. ----
    vmem_est = w_bytes + 2 * b_bytes + per_row * tm
    vmem_ceiling = min(int(cap * 0.9), 100 * 1024 * 1024)
    vmem_limit = vmem_est + max(vmem_est // 4, 4 * 1024 * 1024)
    vmem_limit = int(min(max(vmem_limit, 32 * 1024 * 1024), vmem_ceiling))

    cost = pl.CostEstimate(
        flops=2 * M * H * H + 2 * M * H,
        transcendentals=0,
        bytes_accessed=(M * H * x_item * (grid_n + (1 if n_tiled else 0))
                        + H * H * w_item + H * 4
                        + M * H * out_item))

    if not n_tiled:
        grid_spec = pltpu.PrefetchScalarGridSpec(
            num_scalar_prefetch=0,
            grid=(grid_m,),
            in_specs=[
                pl.BlockSpec((tm, H), lambda i: (i, 0),
                             pipeline_mode=pl.Buffered(x_bufs)),    # streamed x tiles
                pl.BlockSpec((H, H), lambda i: (0, 0),
                             pipeline_mode=pl.Buffered(1)),         # VMEM-resident W
                pl.BlockSpec((1, H), lambda i: (0, 0),
                             pipeline_mode=pl.Buffered(1)),         # VMEM-resident b
            ],
            out_specs=pl.BlockSpec((tm, H), lambda i: (i, 0)),
        )
        kernel = _residual_linear_kernel
        operands = (x2, wt, b2)
        dims = ("parallel",)
    else:
        grid_spec = pltpu.PrefetchScalarGridSpec(
            num_scalar_prefetch=0,
            grid=(grid_n, grid_m),
            in_specs=[
                pl.BlockSpec((tm, H), lambda n, m: (m, 0)),         # matmul operand
                pl.BlockSpec((tm, tn), lambda n, m: (m, n)),        # residual slice
                pl.BlockSpec((H, tn), lambda n, m: (0, n),
                             pipeline_mode=pl.Buffered(1)),         # streamed W columns
                pl.BlockSpec((1, tn), lambda n, m: (0, n),
                             pipeline_mode=pl.Buffered(1)),
            ],
            out_specs=pl.BlockSpec((tm, tn), lambda n, m: (m, n)),
        )
        kernel = _residual_linear_ntiled_kernel
        operands = (x2, x2, wt, b2)
        dims = ("parallel", "parallel")

    out = pl.pallas_call(
        kernel,
        out_shape=jax.ShapeDtypeStruct((M, H), out_dtype),
        grid_spec=grid_spec,
        compiler_params=pltpu.CompilerParams(
            dimension_semantics=dims,
            vmem_limit_bytes=vmem_limit),
        cost_estimate=cost,
    )(*operands)
    return out.reshape(B, S, H)


if __name__ == "__main__":
    # --- 1) small-shape exact f32 check (bf16 MXU disabled) ------------------
    kx, kw, kb = jax.random.split(jax.random.PRNGKey(0), 3)
    B, S, H = 2, 8, 32
    x = jax.random.normal(kx, (B, S, H), dtype=jnp.float32)
    w = jax.random.normal(kw, (H, H), dtype=jnp.float32) * 0.02   # nn.Linear(H, H) weight
    b = jax.random.normal(kb, (H,), dtype=jnp.float32) * 0.02     # nn.Linear(H, H) bias

    out = jax.block_until_ready(residual_add_linear(x, w, b, use_bf16_matmul=False))
    ref = x @ w.T + b + x                                          # fn(x) + x
    assert out.shape == (B, S, H)
    assert jnp.allclose(out, ref, atol=1e-5, rtol=1e-5), "f32 path mismatch"

    # --- 2) multi-M-tile, default bf16 MXU path (full-precision residual) ----
    kx2, kw2, kb2 = jax.random.split(jax.random.PRNGKey(1), 3)
    B2, S2, H2 = 4, 512, 256                                       # M = 2048 -> 4 tiles of 512
    x2 = jax.random.normal(kx2, (B2, S2, H2), dtype=jnp.float32)
    w2 = jax.random.normal(kw2, (H2, H2), dtype=jnp.float32) * 0.02
    b2 = jax.random.normal(kb2, (H2,), dtype=jnp.float32) * 0.02

    out2 = jax.block_until_ready(residual_add_linear(x2, w2, b2, tm=512))
    xb = x2.astype(jnp.bfloat16).astype(jnp.float32)
    wb = w2.astype(jnp.bfloat16).astype(jnp.float32)
    ref2 = xb @ wb.T + b2 + x2                                     # residual is full-precision x
    assert out2.shape == (B2, S2, H2)
    assert jnp.allclose(out2, ref2, atol=5e-3, rtol=5e-3), "bf16 path mismatch"

    # --- 3) forced N-tiling path (tn < H), exercises the 2-D grid kernel -----
    kx3, kw3, kb3 = jax.random.split(jax.random.PRNGKey(2), 3)
    B3, S3, H3 = 2, 512, 256
    x3 = jax.random.normal(kx3, (B3, S3, H3), dtype=jnp.float32)
    w3 = jax.random.normal(kw3, (H3, H3), dtype=jnp.float32) * 0.02
    b3 = jax.random.normal(kb3, (H3,), dtype=jnp.float32) * 0.02

    out3 = jax.block_until_ready(residual_add_linear(x3, w3, b3, tm=256, tn=128))
    xb3 = x3.astype(jnp.bfloat16).astype(jnp.float32)
    wb3 = w3.astype(jnp.bfloat16).astype(jnp.float32)
    ref3 = xb3 @ wb3.T + b3 + x3
    assert out3.shape == (B3, S3, H3)
    assert jnp.allclose(out3, ref3, atol=5e-3, rtol=5e-3), "N-tiled path mismatch"

    print("KERNEL_OK")
</pallas_src>

<mosaic_0001>
module attributes {stable_mosaic.version = 11 : i64} {
  func.func @_residual_linear_kernel(%arg0: i32, %arg1: memref<16x32xf32, #tpu.memory_space<vmem>>, %arg2: memref<32x32xf32, #tpu.memory_space<vmem>>, %arg3: memref<1x32xf32, #tpu.memory_space<vmem>>, %arg4: memref<16x32xf32, #tpu.memory_space<vmem>>) attributes {dimension_semantics = [#tpu.dimension_semantics<parallel>], iteration_bounds = array<i64: 1>, scalar_prefetch = 0 : i64, scratch_operands = 0 : i64, tpu.core_type = #tpu.core_type<tc>, window_params = [{pipeline_mode = #tpu.pipeline_mode<double_buffered>, transform_indices = @transform_0, window_bounds = array<i64: 16, 32>}, {pipeline_mode = #tpu.pipeline_mode<synchronous>, transform_indices = @transform_1, window_bounds = array<i64: 32, 32>}, {pipeline_mode = #tpu.pipeline_mode<synchronous>, transform_indices = @transform_2, window_bounds = array<i64: 1, 32>}, {transform_indices = @transform_3, window_bounds = array<i64: 16, 32>}]} {
    %c0 = arith.constant 0 : index
    %c0_0 = arith.constant 0 : index
    %0 = vector.load %arg1[%c0, %c0_0] : memref<16x32xf32, #tpu.memory_space<vmem>>, vector<16x32xf32>
    %c0_1 = arith.constant 0 : index
    %c0_2 = arith.constant 0 : index
    %1 = vector.load %arg2[%c0_1, %c0_2] : memref<32x32xf32, #tpu.memory_space<vmem>>, vector<32x32xf32>
    %cst = arith.constant dense<0.000000e+00> : vector<16x32xf32>
    %2 = tpu.matmul %0, %1, %cst {dimension_numbers = #tpu.dot_dimension_numbers<[1], [0], [0], [1], [0, 0, 1, 1], [], []>} : vector<16x32xf32>, vector<32x32xf32>, vector<16x32xf32> -> vector<16x32xf32>
    %c0_3 = arith.constant 0 : index
    %c0_4 = arith.constant 0 : index
    %3 = vector.load %arg3[%c0_3, %c0_4] : memref<1x32xf32, #tpu.memory_space<vmem>>, vector<1x32xf32>
    %4 = vector.broadcast %3 : vector<1x32xf32> to vector<16x32xf32>
    %5 = arith.addf %2, %4 : vector<16x32xf32>
    %6 = arith.addf %5, %0 : vector<16x32xf32>
    %c0_5 = arith.constant 0 : index
    %c0_6 = arith.constant 0 : index
    %7 = vector.load %arg4[%c0_5, %c0_6] : memref<16x32xf32, #tpu.memory_space<vmem>>, vector<16x32xf32>
    tpu.vector_store %arg4[%c0_5, %c0_6], %6 {strides = array<i32>} : memref<16x32xf32, #tpu.memory_space<vmem>>, vector<16x32xf32>,
    return
  }
  func.func @transform_0(%arg0: i32) -> (i32, i32) {
    %c0_i32 = arith.constant 0 : i32
    %c0_i32_0 = arith.constant 0 : i32
    return %arg0, %c0_i32 : i32, i32
  }
  func.func @transform_1(%arg0: i32) -> (i32, i32) {
    %c0_i32 = arith.constant 0 : i32
    %c0_i32_0 = arith.constant 0 : i32
    %c0_i32_1 = arith.constant 0 : i32
    return %c0_i32, %c0_i32_0 : i32, i32
  }
  func.func @transform_2(%arg0: i32) -> (i32, i32) {
    %c0_i32 = arith.constant 0 : i32
    %c0_i32_0 = arith.constant 0 : i32
    %c0_i32_1 = arith.constant 0 : i32
    return %c0_i32, %c0_i32_0 : i32, i32
  }
  func.func @transform_3(%arg0: i32) -> (i32, i32) {
    %c0_i32 = arith.constant 0 : i32
    %c0_i32_0 = arith.constant 0 : i32
    return %arg0, %c0_i32 : i32, i32
  }
}

</mosaic_0001>

<bundles_post_ra>
// kernel: tpu_custom_call.1
= control target key start
LH: loop header
LB: loop body
LE: loop exit
PB: predicated region body
PF: predicated region fallthrough
CT: control target
= control target key end

     0   :  { %8 = vsyncpa [#allocation3], 0  ;;  %s342_s0 = inlined_call_operand.hbm [shape: f32[16,32], index: 0, kind: input, shape index: {}]   ;;  %s343_s1 = inlined_call_operand.hbm [shape: f32[32,32], index: 1, kind: input, shape index: {}]   ;;  %s344_s2 = inlined_call_operand.vmem [shape: f32[1,32], index: 2, kind: input, shape index: {}]   ;;  %s345_s3 = inlined_call_operand.hbm [shape: f32[16,32], index: 3, kind: output, shape index: {}]  }
   0x1   :  { %9 = vsyncpa [#allocation6], 0 }
   0x2   :  { %10 = vsyncpa [#allocation4], 0  ;;  %s265_s12 = smov [#allocation2]   ;;  %s193_s16 = scalar_lea.hbm %s342_s0, 256 }
   0x3   :  { %s16_s13 = sshll.u32 %s265_s12, 4  ;;  %p194_p0 = scmp.ne.s32.totalorder %s342_s0, %s193_s16  ;;  %s17_s13 = int_to_ptr.vmem [resolvable:$true] %s16_s13 }
   0x4   :  { %p197_p1 = scmp.lt.u32.totalorder %s193_s16, %s342_s0 }
   0x6   :  { %p199_p2 = pnand %p197_p1, %p194_p0 }
   0x8   :  { %202 = shalt.err (!%p199_p2)
}
   0x9   :  { %s203_s21 = scalar_lea.vmem %s17_s13, 256  ;;  %p208_p4 = scmp.lt.s32.totalorder %s17_s13, %s17_s13 }
   0xa   :  { %p204_p3 = scmp.ne.s32.totalorder %s17_s13, %s203_s21  ;;  %p209_p5 = scmp.lt.s32.totalorder %s203_s21, %s203_s21 }
   0xc   :  { %p210_p6 = por %p209_p5, %p208_p4 }
   0xe   :  { %p211_p7 = pnand %p210_p6, %p204_p3 }
  0x10   :  { %214 = shalt.err (!%p211_p7)
}
  0x11   :  { %s266_s22 = smov 128   ;;  %s267_s23 = smov 8  }
  0x12   :  { %22 = dma.hbm_to_vmem [thread:$0]  %s342_s0, 256, %s17_s13, [#allocation3], %s266_s22, %s266_s22, %s267_s23  }
  0x13   :  { %s268_s26 = smov [#allocation5]   ;;  %s215_s30 = scalar_lea.hbm %s343_s1, 512 }
  0x14   :  { %s28_s27 = sshll.u32 %s268_s26, 4  ;;  %p216_p8 = scmp.ne.s32.totalorder %s343_s1, %s215_s30  ;;  %s29_s27 = int_to_ptr.vmem [resolvable:$true] %s28_s27 }
  0x15   :  { %p219_p9 = scmp.lt.u32.totalorder %s215_s30, %s343_s1 }
  0x17   :  { %p221_p10 = pnand %p219_p9, %p216_p8 }
  0x19   :  { %224 = shalt.err (!%p221_p10)
}
  0x1a   :  { %s225_s8 = scalar_lea.vmem %s29_s27, 512  ;;  %p230_p12 = scmp.lt.s32.totalorder %s29_s27, %s29_s27 }
  0x1b   :  { %p226_p11 = scmp.ne.s32.totalorder %s29_s27, %s225_s8  ;;  %p231_p13 = scmp.lt.s32.totalorder %s225_s8, %s225_s8 }
  0x1d   :  { %p232_p0 = por %p231_p13, %p230_p12 }
  0x1f   :  { %p233_p1 = pnand %p232_p0, %p226_p11 }
  0x21   :  { %236 = shalt.err (!%p233_p1)
}
  0x22   :  { %34 = dma.hbm_to_vmem [thread:$0]  %s343_s1, 512, %s29_s27, [#allocation6], %s266_s22, %s266_s22, %s267_s23  }
  0x23   :  { %259 = dma.done.wait [#allocation3], 256  }
  0x24   :  { %260 = vsyncadd [#allocation3], 4294967040 }
  0x25   :  { %261 = dma.done.wait [#allocation6], 512  }
  0x26   :  { %262 = vsyncadd [#allocation6], 4294966784  ;;  %vm56_vm0 = vcmask 261120   ;;  %v45_v0 = vld [vmem:[#allocation5] sm:$0xff]  ;;  %v46_v1 = vld [vmem:[#allocation5 + $0x8] sm:$0xff]  ;;  %s269_s11 = smov [#allocation7]  }
  0x27   :  { %v47_v2 = vld [vmem:[#allocation5 + $0x10] sm:$0xff]  ;;  %v180_v3 = vpack.c.bf16 %v46_v1, %v45_v0  ;;  %v48_v4 = vld [vmem:[#allocation5 + $0x18] sm:$0xff]  ;;  %s147_s12 = sshll.u32 %s269_s11, 4  ;;  %s148_s12 = int_to_ptr.vmem [resolvable:$true] %s147_s12 }
  0x28   :  { %v43_v5 = vld [vmem:[#allocation2] sm:$0xff]  ;;  %v184_v6 = vpack.c.bf16 %v48_v4, %v47_v2  ;;  %v44_v7 = vld [vmem:[#allocation2 + $0x8] sm:$0xff]  ;;  %s237_s13 = scalar_lea.vmem %s148_s12, 256  ;;  %p242_p3 = scmp.lt.s32.totalorder %s148_s12, %s148_s12 }
  0x29   :  { %177 = vmatprep.mubr.msk.f32.mxu0 %vm56_vm0, %v43_v5  ;;  %181 = vmatprep.subr.bf16.mxu0 %v180_v3  ;;  %v160_v8 = vld [vmem:[%s344_s2] ss:$0 sm:$0xff]  ;;  %p238_p2 = scmp.ne.s32.totalorder %s148_s12, %s237_s13  ;;  %p243_p4 = scmp.lt.s32.totalorder %s237_s13, %s237_s13 }
  0x2a   :  { %183 = vmatpush3.bf16.msra.mxu0 %v180_v3 }
  0x2b   :  { %185 = vmatprep.subr.bf16.mxu0 %v184_v6  ;;  %p244_p5 = por %p243_p4, %p242_p3 }
  0x2d   :  { %p245_p6 = pnand %p244_p5, %p238_p2 }
  0x2e   :  { %187 = vmatpush3.bf16.msra.mxu0 %v184_v6 }
  0x31   :  { %178 = vmatmul.mubr.msk.f32.vlgmr.msra.gmra.mrb[0].mxu0 %vm56_vm0, %v44_v7 }
 0x104   :  { %v179_v9 = vpop.f32.mrb[0].mxu0 }
 0x105   :  { %v135_v10 = vadd.f32 %v179_v9, %v160_v8  ;;  %v129_v11 = vpop.f32.mrb[1].mxu0 }
 0x106   :  { %v130_v12 = vadd.f32 %v160_v8, %v129_v11 }
 0x107   :  { %v139_v13 = vadd.f32 %v135_v10, %v44_v7 }
 0x108   :  { %v138_v14 = vadd.f32 %v130_v12, %v43_v5 }
 0x109   :  { %141 = vst.msk [vmem:[#allocation7 + $0x8] sm:$0xff] %vm56_vm0, %v139_v13 }
 0x10a   :  { %140 = vst.msk [vmem:[#allocation7] sm:$0xff] %vm56_vm0, %v138_v14 }
 0x10b   :  { %248 = shalt.err (!%p245_p6)
}
 0x10c   :  { %s249_s15 = scalar_lea.hbm %s345_s3, 256 }
 0x10d   :  { %p250_p7 = scmp.ne.s32.totalorder %s345_s3, %s249_s15  ;;  %p253_p8 = scmp.lt.u32.totalorder %s249_s15, %s345_s3 }
 0x10f   :  { %p255_p9 = pnand %p253_p8, %p250_p7 }
 0x111   :  { %258 = shalt.err (!%p255_p9)
}
 0x112   :  { %153 = dma.vmem_to_hbm [thread:$0]  %s148_s12, 256, %s345_s3, [#allocation4], %s266_s22, %s266_s22, %s267_s23  }
 0x113   :  { %263 = dma.done.wait [#allocation4], 256  }
 0x114   :  { %264 = vsyncadd [#allocation4], 4294967040 }
 0x115   :  { %157 = vsyncpa [#allocation3], 1 }
 0x116   :  { %158 = vsyncpa [#allocation6], 1 }
 0x117   :  { %159 = vsyncpa [#allocation4], 1 }

</bundles_post_ra>
